<compile_context>
chip_gen: v7x
topology: tpu7x:2x2x1
jax: 0.10.0
libtpu: 0.0.40
codegen_flags: <defaults>
</compile_context>

<pallas_src>
import jax
import jax.numpy as jnp
from jax.experimental import pallas as pl
from jax.experimental.pallas import tpu as pltpu

LANE = 128
IN_FEATURES = 2
HIDDEN = 8


def _mlp_kernel(x_ref, w1_ref, b1_ref, w2_ref, b2_ref, o_ref):
    # x_ref:  (2, BLOCK) VMEM  -- batch on the lane axis
    # w1_ref: (2, 8)  SMEM, b1_ref: (8,) SMEM, w2_ref: (8,) SMEM, b2_ref: (1,) SMEM
    # o_ref:  (1, BLOCK) VMEM  -- lane-dense output
    x0 = x_ref[0:1, :]          # (1, BLOCK)
    x1 = x_ref[1:2, :]          # (1, BLOCK)

    acc = jnp.zeros_like(x0)
    for j in range(HIDDEN):     # unrolled 8-way VPU FMA chain (no MXU)
        h = x0 * w1_ref[0, j] + x1 * w1_ref[1, j] + b1_ref[j]
        h = jnp.maximum(h, 0.0)                      # ReLU
        acc = acc + h * w2_ref[j]

    o_ref[...] = acc + b2_ref[0]


def net_forward(x, w1, b1, w2, b2, *, block_b=None):
    """x: (B, 2) float32 -> (B, 1) float32 (same math as the PyTorch Net)."""
    B = x.shape[0]
    assert x.shape[1] == IN_FEATURES

    # Pad the batch to a lane multiple, then to a multiple of the block size.
    b_pad = ((B + LANE - 1) // LANE) * LANE
    if block_b is None:
        # ~1 MiB f32 per x block (2 x 128K lanes): fits comfortably in v5e's
        # 16 MiB scoped VMEM with double buffering, still >= 1 MiB tiles on v7x.
        block_b = min(b_pad, 128 * 1024)
    block_b = max(LANE, (block_b // LANE) * LANE)
    b_pad = ((b_pad + block_b - 1) // block_b) * block_b
    grid = (b_pad // block_b,)

    # Lane-dense layout: batch on the last (lane) axis.
    x_pad = jnp.zeros((IN_FEATURES, b_pad), jnp.float32)
    x_pad = x_pad.at[:, :B].set(x.T.astype(jnp.float32))

    w1_s = w1.astype(jnp.float32)                    # (2, 8)
    b1_s = b1.reshape(HIDDEN).astype(jnp.float32)    # (8,)
    w2_s = w2.reshape(HIDDEN).astype(jnp.float32)    # (8,)
    b2_s = b2.reshape(1).astype(jnp.float32)         # (1,)

    out = pl.pallas_call(
        _mlp_kernel,
        out_shape=jax.ShapeDtypeStruct((1, b_pad), jnp.float32),
        grid=grid,
        in_specs=[
            pl.BlockSpec((IN_FEATURES, block_b), lambda i: (0, i)),      # x tile
            pl.BlockSpec(memory_space=pltpu.MemorySpace.SMEM),           # w1 (resident)
            pl.BlockSpec(memory_space=pltpu.MemorySpace.SMEM),           # b1
            pl.BlockSpec(memory_space=pltpu.MemorySpace.SMEM),           # w2
            pl.BlockSpec(memory_space=pltpu.MemorySpace.SMEM),           # b2
        ],
        out_specs=pl.BlockSpec((1, block_b), lambda i: (0, i)),
        compiler_params=pltpu.CompilerParams(
            dimension_semantics=("parallel",)),
    )(x_pad, w1_s, b1_s, w2_s, b2_s)

    return out[0, :B].reshape(B, 1)


def init_params(key):
    """Mimic PyTorch nn.Linear default init: U(-1/sqrt(fan_in), 1/sqrt(fan_in))."""
    k1, k2, k3, k4 = jax.random.split(key, 4)

    bound1 = 1.0 / jnp.sqrt(IN_FEATURES)
    w1 = jax.random.uniform(k1, (IN_FEATURES, HIDDEN), jnp.float32, -bound1, bound1)
    b1 = jax.random.uniform(k2, (HIDDEN,), jnp.float32, -bound1, bound1)

    bound2 = 1.0 / jnp.sqrt(HIDDEN)
    w2 = jax.random.uniform(k3, (HIDDEN, 1), jnp.float32, -bound2, bound2)
    b2 = jax.random.uniform(k4, (1,), jnp.float32, -bound2, bound2)

    return w1, b1, w2, b2


def _reference(x, w1, b1, w2, b2):
    return jnp.maximum(x @ w1 + b1, 0.0) @ w2 + b2


if __name__ == "__main__":
    key = jax.random.PRNGKey(0)
    k_params, k_x1, k_x2 = jax.random.split(key, 3)

    w1, b1, w2, b2 = init_params(k_params)

    # Small batch, consistent with Linear(2, 8) (single block, padded to 128 lanes).
    x_small = jax.random.normal(k_x1, (8, IN_FEATURES), jnp.float32)
    y_small = jax.block_until_ready(net_forward(x_small, w1, b1, w2, b2))
    assert y_small.shape == (8, 1)
    assert jnp.allclose(y_small, _reference(x_small, w1, b1, w2, b2),
                        atol=1e-5, rtol=1e-5)

    # Non-multiple-of-128 batch with a small block size to exercise the
    # multi-step grid + padding path.
    x_big = jax.random.normal(k_x2, (300, IN_FEATURES), jnp.float32)
    y_big = jax.block_until_ready(net_forward(x_big, w1, b1, w2, b2, block_b=128))
    assert y_big.shape == (300, 1)
    assert jnp.allclose(y_big, _reference(x_big, w1, b1, w2, b2),
                        atol=1e-5, rtol=1e-5)

    print("KERNEL_OK")
</pallas_src>

<mosaic_0001>
module attributes {stable_mosaic.version = 11 : i64} {
  func.func @_mlp_kernel(%arg0: i32, %arg1: memref<2x128xf32, #tpu.memory_space<vmem>>, %arg2: memref<2x8xf32, #tpu.memory_space<smem>>, %arg3: memref<8xf32, #tpu.memory_space<smem>>, %arg4: memref<8xf32, #tpu.memory_space<smem>>, %arg5: memref<1xf32, #tpu.memory_space<smem>>, %arg6: memref<1x128xf32, #tpu.memory_space<vmem>>) attributes {dimension_semantics = [#tpu.dimension_semantics<parallel>], iteration_bounds = array<i64: 1>, scalar_prefetch = 0 : i64, scratch_operands = 0 : i64, tpu.core_type = #tpu.core_type<tc>, window_params = [{transform_indices = @transform_0, window_bounds = array<i64: 2, 128>}, {transform_indices = @transform_1, window_bounds = array<i64: 2, 8>}, {transform_indices = @transform_2, window_bounds = array<i64: 8>}, {transform_indices = @transform_3, window_bounds = array<i64: 8>}, {transform_indices = @transform_4, window_bounds = array<i64: 1>}, {transform_indices = @transform_5, window_bounds = array<i64: 1, 128>}]} {
    %c0 = arith.constant 0 : index
    %c0_0 = arith.constant 0 : index
    %0 = vector.load %arg1[%c0, %c0_0] : memref<2x128xf32, #tpu.memory_space<vmem>>, vector<1x128xf32>
    %c1 = arith.constant 1 : index
    %c0_1 = arith.constant 0 : index
    %1 = vector.load %arg1[%c1, %c0_1] : memref<2x128xf32, #tpu.memory_space<vmem>>, vector<1x128xf32>
    %cst = arith.constant 0.000000e+00 : f32
    %2 = vector.broadcast %cst : f32 to vector<1x128xf32>
    %c0_2 = arith.constant 0 : index
    %c0_3 = arith.constant 0 : index
    %3 = memref.load %arg2[%c0_2, %c0_3] : memref<2x8xf32, #tpu.memory_space<smem>>
    %4 = vector.broadcast %3 : f32 to vector<1x128xf32>
    %5 = arith.mulf %0, %4 : vector<1x128xf32>
    %c1_4 = arith.constant 1 : index
    %c0_5 = arith.constant 0 : index
    %6 = memref.load %arg2[%c1_4, %c0_5] : memref<2x8xf32, #tpu.memory_space<smem>>
    %7 = vector.broadcast %6 : f32 to vector<1x128xf32>
    %8 = arith.mulf %1, %7 : vector<1x128xf32>
    %9 = arith.addf %5, %8 : vector<1x128xf32>
    %c0_6 = arith.constant 0 : index
    %10 = memref.load %arg3[%c0_6] : memref<8xf32, #tpu.memory_space<smem>>
    %11 = vector.broadcast %10 : f32 to vector<1x128xf32>
    %12 = arith.addf %9, %11 : vector<1x128xf32>
    %cst_7 = arith.constant 0.000000e+00 : f32
    %13 = vector.broadcast %cst_7 : f32 to vector<1x128xf32>
    %14 = arith.maximumf %12, %13 : vector<1x128xf32>
    %c0_8 = arith.constant 0 : index
    %15 = memref.load %arg4[%c0_8] : memref<8xf32, #tpu.memory_space<smem>>
    %16 = vector.broadcast %15 : f32 to vector<1x128xf32>
    %17 = arith.mulf %14, %16 : vector<1x128xf32>
    %18 = arith.addf %2, %17 : vector<1x128xf32>
    %c0_9 = arith.constant 0 : index
    %c1_10 = arith.constant 1 : index
    %19 = memref.load %arg2[%c0_9, %c1_10] : memref<2x8xf32, #tpu.memory_space<smem>>
    %20 = vector.broadcast %19 : f32 to vector<1x128xf32>
    %21 = arith.mulf %0, %20 : vector<1x128xf32>
    %c1_11 = arith.constant 1 : index
    %c1_12 = arith.constant 1 : index
    %22 = memref.load %arg2[%c1_11, %c1_12] : memref<2x8xf32, #tpu.memory_space<smem>>
    %23 = vector.broadcast %22 : f32 to vector<1x128xf32>
    %24 = arith.mulf %1, %23 : vector<1x128xf32>
    %25 = arith.addf %21, %24 : vector<1x128xf32>
    %c1_13 = arith.constant 1 : index
    %26 = memref.load %arg3[%c1_13] : memref<8xf32, #tpu.memory_space<smem>>
    %27 = vector.broadcast %26 : f32 to vector<1x128xf32>
    %28 = arith.addf %25, %27 : vector<1x128xf32>
    %cst_14 = arith.constant 0.000000e+00 : f32
    %29 = vector.broadcast %cst_14 : f32 to vector<1x128xf32>
    %30 = arith.maximumf %28, %29 : vector<1x128xf32>
    %c1_15 = arith.constant 1 : index
    %31 = memref.load %arg4[%c1_15] : memref<8xf32, #tpu.memory_space<smem>>
    %32 = vector.broadcast %31 : f32 to vector<1x128xf32>
    %33 = arith.mulf %30, %32 : vector<1x128xf32>
    %34 = arith.addf %18, %33 : vector<1x128xf32>
    %c0_16 = arith.constant 0 : index
    %c2 = arith.constant 2 : index
    %35 = memref.load %arg2[%c0_16, %c2] : memref<2x8xf32, #tpu.memory_space<smem>>
    %36 = vector.broadcast %35 : f32 to vector<1x128xf32>
    %37 = arith.mulf %0, %36 : vector<1x128xf32>
    %c1_17 = arith.constant 1 : index
    %c2_18 = arith.constant 2 : index
    %38 = memref.load %arg2[%c1_17, %c2_18] : memref<2x8xf32, #tpu.memory_space<smem>>
    %39 = vector.broadcast %38 : f32 to vector<1x128xf32>
    %40 = arith.mulf %1, %39 : vector<1x128xf32>
    %41 = arith.addf %37, %40 : vector<1x128xf32>
    %c2_19 = arith.constant 2 : index
    %42 = memref.load %arg3[%c2_19] : memref<8xf32, #tpu.memory_space<smem>>
    %43 = vector.broadcast %42 : f32 to vector<1x128xf32>
    %44 = arith.addf %41, %43 : vector<1x128xf32>
    %cst_20 = arith.constant 0.000000e+00 : f32
    %45 = vector.broadcast %cst_20 : f32 to vector<1x128xf32>
    %46 = arith.maximumf %44, %45 : vector<1x128xf32>
    %c2_21 = arith.constant 2 : index
    %47 = memref.load %arg4[%c2_21] : memref<8xf32, #tpu.memory_space<smem>>
    %48 = vector.broadcast %47 : f32 to vector<1x128xf32>
    %49 = arith.mulf %46, %48 : vector<1x128xf32>
    %50 = arith.addf %34, %49 : vector<1x128xf32>
    %c0_22 = arith.constant 0 : index
    %c3 = arith.constant 3 : index
    %51 = memref.load %arg2[%c0_22, %c3] : memref<2x8xf32, #tpu.memory_space<smem>>
    %52 = vector.broadcast %51 : f32 to vector<1x128xf32>
    %53 = arith.mulf %0, %52 : vector<1x128xf32>
    %c1_23 = arith.constant 1 : index
    %c3_24 = arith.constant 3 : index
    %54 = memref.load %arg2[%c1_23, %c3_24] : memref<2x8xf32, #tpu.memory_space<smem>>
    %55 = vector.broadcast %54 : f32 to vector<1x128xf32>
    %56 = arith.mulf %1, %55 : vector<1x128xf32>
    %57 = arith.addf %53, %56 : vector<1x128xf32>
    %c3_25 = arith.constant 3 : index
    %58 = memref.load %arg3[%c3_25] : memref<8xf32, #tpu.memory_space<smem>>
    %59 = vector.broadcast %58 : f32 to vector<1x128xf32>
    %60 = arith.addf %57, %59 : vector<1x128xf32>
    %cst_26 = arith.constant 0.000000e+00 : f32
    %61 = vector.broadcast %cst_26 : f32 to vector<1x128xf32>
    %62 = arith.maximumf %60, %61 : vector<1x128xf32>
    %c3_27 = arith.constant 3 : index
    %63 = memref.load %arg4[%c3_27] : memref<8xf32, #tpu.memory_space<smem>>
    %64 = vector.broadcast %63 : f32 to vector<1x128xf32>
    %65 = arith.mulf %62, %64 : vector<1x128xf32>
    %66 = arith.addf %50, %65 : vector<1x128xf32>
    %c0_28 = arith.constant 0 : index
    %c4 = arith.constant 4 : index
    %67 = memref.load %arg2[%c0_28, %c4] : memref<2x8xf32, #tpu.memory_space<smem>>
    %68 = vector.broadcast %67 : f32 to vector<1x128xf32>
    %69 = arith.mulf %0, %68 : vector<1x128xf32>
    %c1_29 = arith.constant 1 : index
    %c4_30 = arith.constant 4 : index
    %70 = memref.load %arg2[%c1_29, %c4_30] : memref<2x8xf32, #tpu.memory_space<smem>>
    %71 = vector.broadcast %70 : f32 to vector<1x128xf32>
    %72 = arith.mulf %1, %71 : vector<1x128xf32>
    %73 = arith.addf %69, %72 : vector<1x128xf32>
    %c4_31 = arith.constant 4 : index
    %74 = memref.load %arg3[%c4_31] : memref<8xf32, #tpu.memory_space<smem>>
    %75 = vector.broadcast %74 : f32 to vector<1x128xf32>
    %76 = arith.addf %73, %75 : vector<1x128xf32>
    %cst_32 = arith.constant 0.000000e+00 : f32
    %77 = vector.broadcast %cst_32 : f32 to vector<1x128xf32>
    %78 = arith.maximumf %76, %77 : vector<1x128xf32>
    %c4_33 = arith.constant 4 : index
    %79 = memref.load %arg4[%c4_33] : memref<8xf32, #tpu.memory_space<smem>>
    %80 = vector.broadcast %79 : f32 to vector<1x128xf32>
    %81 = arith.mulf %78, %80 : vector<1x128xf32>
    %82 = arith.addf %66, %81 : vector<1x128xf32>
    %c0_34 = arith.constant 0 : index
    %c5 = arith.constant 5 : index
    %83 = memref.load %arg2[%c0_34, %c5] : memref<2x8xf32, #tpu.memory_space<smem>>
    %84 = vector.broadcast %83 : f32 to vector<1x128xf32>
    %85 = arith.mulf %0, %84 : vector<1x128xf32>
    %c1_35 = arith.constant 1 : index
    %c5_36 = arith.constant 5 : index
    %86 = memref.load %arg2[%c1_35, %c5_36] : memref<2x8xf32, #tpu.memory_space<smem>>
    %87 = vector.broadcast %86 : f32 to vector<1x128xf32>
    %88 = arith.mulf %1, %87 : vector<1x128xf32>
    %89 = arith.addf %85, %88 : vector<1x128xf32>
    %c5_37 = arith.constant 5 : index
    %90 = memref.load %arg3[%c5_37] : memref<8xf32, #tpu.memory_space<smem>>
    %91 = vector.broadcast %90 : f32 to vector<1x128xf32>
    %92 = arith.addf %89, %91 : vector<1x128xf32>
    %cst_38 = arith.constant 0.000000e+00 : f32
    %93 = vector.broadcast %cst_38 : f32 to vector<1x128xf32>
    %94 = arith.maximumf %92, %93 : vector<1x128xf32>
    %c5_39 = arith.constant 5 : index
    %95 = memref.load %arg4[%c5_39] : memref<8xf32, #tpu.memory_space<smem>>
    %96 = vector.broadcast %95 : f32 to vector<1x128xf32>
    %97 = arith.mulf %94, %96 : vector<1x128xf32>
    %98 = arith.addf %82, %97 : vector<1x128xf32>
    %c0_40 = arith.constant 0 : index
    %c6 = arith.constant 6 : index
    %99 = memref.load %arg2[%c0_40, %c6] : memref<2x8xf32, #tpu.memory_space<smem>>
    %100 = vector.broadcast %99 : f32 to vector<1x128xf32>
    %101 = arith.mulf %0, %100 : vector<1x128xf32>
    %c1_41 = arith.constant 1 : index
    %c6_42 = arith.constant 6 : index
    %102 = memref.load %arg2[%c1_41, %c6_42] : memref<2x8xf32, #tpu.memory_space<smem>>
    %103 = vector.broadcast %102 : f32 to vector<1x128xf32>
    %104 = arith.mulf %1, %103 : vector<1x128xf32>
    %105 = arith.addf %101, %104 : vector<1x128xf32>
    %c6_43 = arith.constant 6 : index
    %106 = memref.load %arg3[%c6_43] : memref<8xf32, #tpu.memory_space<smem>>
    %107 = vector.broadcast %106 : f32 to vector<1x128xf32>
    %108 = arith.addf %105, %107 : vector<1x128xf32>
    %cst_44 = arith.constant 0.000000e+00 : f32
    %109 = vector.broadcast %cst_44 : f32 to vector<1x128xf32>
    %110 = arith.maximumf %108, %109 : vector<1x128xf32>
    %c6_45 = arith.constant 6 : index
    %111 = memref.load %arg4[%c6_45] : memref<8xf32, #tpu.memory_space<smem>>
    %112 = vector.broadcast %111 : f32 to vector<1x128xf32>
    %113 = arith.mulf %110, %112 : vector<1x128xf32>
    %114 = arith.addf %98, %113 : vector<1x128xf32>
    %c0_46 = arith.constant 0 : index
    %c7 = arith.constant 7 : index
    %115 = memref.load %arg2[%c0_46, %c7] : memref<2x8xf32, #tpu.memory_space<smem>>
    %116 = vector.broadcast %115 : f32 to vector<1x128xf32>
    %117 = arith.mulf %0, %116 : vector<1x128xf32>
    %c1_47 = arith.constant 1 : index
    %c7_48 = arith.constant 7 : index
    %118 = memref.load %arg2[%c1_47, %c7_48] : memref<2x8xf32, #tpu.memory_space<smem>>
    %119 = vector.broadcast %118 : f32 to vector<1x128xf32>
    %120 = arith.mulf %1, %119 : vector<1x128xf32>
    %121 = arith.addf %117, %120 : vector<1x128xf32>
    %c7_49 = arith.constant 7 : index
    %122 = memref.load %arg3[%c7_49] : memref<8xf32, #tpu.memory_space<smem>>
    %123 = vector.broadcast %122 : f32 to vector<1x128xf32>
    %124 = arith.addf %121, %123 : vector<1x128xf32>
    %cst_50 = arith.constant 0.000000e+00 : f32
    %125 = vector.broadcast %cst_50 : f32 to vector<1x128xf32>
    %126 = arith.maximumf %124, %125 : vector<1x128xf32>
    %c7_51 = arith.constant 7 : index
    %127 = memref.load %arg4[%c7_51] : memref<8xf32, #tpu.memory_space<smem>>
    %128 = vector.broadcast %127 : f32 to vector<1x128xf32>
    %129 = arith.mulf %126, %128 : vector<1x128xf32>
    %130 = arith.addf %114, %129 : vector<1x128xf32>
    %c0_52 = arith.constant 0 : index
    %131 = memref.load %arg5[%c0_52] : memref<1xf32, #tpu.memory_space<smem>>
    %132 = vector.broadcast %131 : f32 to vector<1x128xf32>
    %133 = arith.addf %130, %132 : vector<1x128xf32>
    %c0_53 = arith.constant 0 : index
    %c0_54 = arith.constant 0 : index
    %134 = vector.load %arg6[%c0_53, %c0_54] : memref<1x128xf32, #tpu.memory_space<vmem>>, vector<1x128xf32>
    tpu.vector_store %arg6[%c0_53, %c0_54], %133 {strides = array<i32>} : memref<1x128xf32, #tpu.memory_space<vmem>>, vector<1x128xf32>,
    return
  }
  func.func @transform_0(%arg0: i32) -> (i32, i32) {
    %c0_i32 = arith.constant 0 : i32
    %c0_i32_0 = arith.constant 0 : i32
    return %c0_i32, %arg0 : i32, i32
  }
  func.func @transform_1(%arg0: i32) -> (i32, i32) {
    %c0_i32 = arith.constant 0 : i32
    %c0_i32_0 = arith.constant 0 : i32
    %c0_i32_1 = arith.constant 0 : i32
    return %c0_i32, %c0_i32_0 : i32, i32
  }
  func.func @transform_2(%arg0: i32) -> i32 {
    %c0_i32 = arith.constant 0 : i32
    %c0_i32_0 = arith.constant 0 : i32
    return %c0_i32 : i32
  }
  func.func @transform_3(%arg0: i32) -> i32 {
    %c0_i32 = arith.constant 0 : i32
    %c0_i32_0 = arith.constant 0 : i32
    return %c0_i32 : i32
  }
  func.func @transform_4(%arg0: i32) -> i32 {
    %c0_i32 = arith.constant 0 : i32
    %c0_i32_0 = arith.constant 0 : i32
    return %c0_i32 : i32
  }
  func.func @transform_5(%arg0: i32) -> (i32, i32) {
    %c0_i32 = arith.constant 0 : i32
    %c0_i32_0 = arith.constant 0 : i32
    return %c0_i32, %arg0 : i32, i32
  }
}

</mosaic_0001>

<bundles_post_ra>
// kernel: tpu_custom_call.1
= control target key start
LH: loop header
LB: loop body
LE: loop exit
PB: predicated region body
PF: predicated region fallthrough
CT: control target
= control target key end

     0   :  { %11 = vsyncpa [#allocation5], 0  ;;  %s456_s0 = inlined_call_operand.vmem [shape: f32[2,128], index: 0, kind: input, shape index: {}]   ;;  %s457_s1 = inlined_call_operand.vmem [shape: f32[2,8], index: 1, kind: input, shape index: {}]   ;;  %s458_s2 = inlined_call_operand.vmem [shape: f32[8], index: 2, kind: input, shape index: {}]   ;;  %s459_s3 = inlined_call_operand.vmem [shape: f32[8], index: 3, kind: input, shape index: {}]   ;;  %s460_s4 = inlined_call_operand.<no memory space> [shape: f32[1], index: 4, kind: input, shape index: {}]   ;;  %s461_s5 = inlined_call_operand.hbm [shape: f32[1,128], index: 5, kind: output, shape index: {}]  }
   0x1   :  { %12 = vsyncpa [#allocation7], 0  ;;  %s32_s20 = sshll.u32 %s458_s2, 4  ;;  %s33_s20 = int_to_ptr.vmem [resolvable:$true] %s32_s20 }
   0x2   :  { %13 = vsyncpa [#allocation4], 0  ;;  %s22_s23 = sshll.u32 %s457_s1, 4  ;;  %s233_s24 = scalar_lea.vmem %s33_s20, 16  ;;  %s23_s23 = int_to_ptr.vmem [resolvable:$true] %s22_s23 }
   0x3   :  { %p234_p0 = scmp.ne.s32.totalorder %s33_s20, %s233_s24  ;;  %p238_p1 = scmp.lt.s32.totalorder %s33_s20, %s33_s20 }
   0x4   :  { %p239_p2 = scmp.lt.s32.totalorder %s233_s24, %s233_s24 }
   0x6   :  { %p240_p3 = por %p239_p2, %p238_p1 }
   0x8   :  { %p241_p4 = pnand %p240_p3, %p234_p0 }
   0xa   :  { %244 = shalt.err (!%p241_p4)
}
   0xb   :  { %s297_s25 = smov [#allocation6]   ;;  %s245_s26 = scalar_lea.vmem %s23_s23, 32 }
   0xc   :  { %35 = dma.vmem_to_smem %s33_s20, 16, %s297_s25, [#allocation7]  }
   0xd   :  { %p246_p5 = scmp.ne.s32.totalorder %s23_s23, %s245_s26  ;;  %p250_p6 = scmp.lt.s32.totalorder %s23_s23, %s23_s23 }
   0xe   :  { %p251_p7 = scmp.lt.s32.totalorder %s245_s26, %s245_s26 }
  0x10   :  { %p252_p8 = por %p251_p7, %p250_p6 }
  0x12   :  { %p253_p9 = pnand %p252_p8, %p246_p5 }
  0x14   :  { %256 = shalt.err (!%p253_p9)
}
  0x15   :  { %s298_s2 = smov [#allocation3]   ;;  %s42_s28 = sshll.u32 %s459_s3, 4  ;;  %s43_s28 = int_to_ptr.vmem [resolvable:$true] %s42_s28 }
  0x16   :  { %25 = dma.vmem_to_smem %s23_s23, 32, %s298_s2, [#allocation5]  }
  0x17   :  { %s257_s29 = scalar_lea.vmem %s43_s28, 16  ;;  %p262_p11 = scmp.lt.s32.totalorder %s43_s28, %s43_s28 }
  0x18   :  { %p258_p10 = scmp.ne.s32.totalorder %s43_s28, %s257_s29  ;;  %p263_p12 = scmp.lt.s32.totalorder %s257_s29, %s257_s29 }
  0x1a   :  { %p264_p13 = por %p263_p12, %p262_p11 }
  0x1c   :  { %p265_p0 = pnand %p264_p13, %p258_p10 }
  0x1e   :  { %268 = shalt.err (!%p265_p0)
}
  0x1f   :  { %s299_s30 = smov [#allocation8]  }
  0x20   :  { %45 = dma.vmem_to_smem %s43_s28, 16, %s299_s30, [#allocation7]  }
  0x21   :  { %291 = dma.done.wait [#allocation5], 32  }
  0x22   :  { %292 = vsyncadd [#allocation5], 4294967264 }
  0x23   :  { %293 = dma.done.wait [#allocation7], 32  }
  0x24   :  { %294 = vsyncadd [#allocation7], 4294967264 }
  0x25   :  { %57 = sfence }
  0x26   :  { %s60_s6 = sld [smem:[#allocation3]]  ;;  %s201_s9 = sld [smem:[#allocation3 + $0x1]]  ;;  %v349_v0 = vld [vmem:[%s456_s0] sm:$0x1]  ;;  %v356_v1 = vld [vmem:[%s456_s0 + $0x1] sm:$0x1] }
  0x27   :  { %s200_s7 = sld [smem:[#allocation3 + $0x80]]  ;;  %s202_s10 = sld [smem:[#allocation3 + $0x81]] }
  0x28   :  { %s340_s8 = sld [smem:[#allocation6]]  ;;  %s344_s11 = sld [smem:[#allocation6 + $0x1]] }
  0x29   :  { %s342_s3 = sld [smem:[#allocation8]]  ;;  %s351_s14 = sld [smem:[#allocation8 + $0x1]] }
  0x2a   :  { %s205_s15 = sld [smem:[#allocation3 + $0x2]]  ;;  %s360_s20 = sld [smem:[#allocation3 + $0x3]] }
  0x2b   :  { %s206_s18 = sld [smem:[#allocation3 + $0x82]]  ;;  %s363_s21 = sld [smem:[#allocation3 + $0x83]] }
  0x2c   :  { %s358_s19 = sld [smem:[#allocation6 + $0x2]]  ;;  %v61_v2 = vstv %s60_s6  ;;  %s365_s22 = sld [smem:[#allocation6 + $0x3]]  ;;  %v76_v6 = vstv %s201_s9 }
  0x2d   :  { %v62_v3 = vmul.f32 %v61_v2, %v349_v0  ;;  %v64_v4 = vstv %s200_s7  ;;  %s368_s23 = sld [smem:[#allocation8 + $0x2]]  ;;  %s370_s0 = sld [smem:[#allocation3 + $0x4]]  ;;  %v77_v8 = vmul.f32 %v76_v6, %v349_v0  ;;  %v79_v9 = vstv %s202_s10 }
  0x2e   :  { %v65_v5 = vmul.f32 %v64_v4, %v356_v1  ;;  %v68_v7 = vstv %s340_s8  ;;  %s374_s24 = sld [smem:[#allocation3 + $0x84]]  ;;  %v80_v11 = vmul.f32 %v79_v9, %v356_v1  ;;  %s379_s26 = sld [smem:[#allocation3 + $0x5]]  ;;  %v83_v13 = vstv %s344_s11 }
  0x2f   :  { %s376_s25 = sld [smem:[#allocation6 + $0x4]]  ;;  %s383_s2 = sld [smem:[#allocation3 + $0x85]]  ;;  %v72_v17 = vstv %s342_s3  ;;  %v87_v20 = vstv %s351_s14 }
  0x30   :  { %v66_v10 = vadd.f32 %v65_v5, %v62_v3  ;;  %v91_v12 = vstv %s205_s15  ;;  %v81_v18 = vadd.f32 %v80_v11, %v77_v8  ;;  %s387_s1 = sld [smem:[#allocation8 + $0x3]]  ;;  %s389_s27 = sld [smem:[#allocation6 + $0x5]]  ;;  %v106_v22 = vstv %s360_s20 }
  0x31   :  { %v92_v14 = vmul.f32 %v91_v12, %v349_v0  ;;  %v94_v15 = vstv %s206_s18  ;;  %v109_v23 = vstv %s363_s21  ;;  %s395_s28 = sld [smem:[#allocation3 + $0x6]]  ;;  %v107_v27 = vmul.f32 %v106_v22, %v349_v0  ;;  %s398_s29 = sld [smem:[#allocation8 + $0x4]] }
  0x32   :  { %v69_v16 = vadd.f32 %v68_v7, %v66_v10  ;;  %v95_v19 = vmul.f32 %v94_v15, %v356_v1  ;;  %v98_v21 = vstv %s358_s19  ;;  %v84_v25 = vadd.f32 %v83_v13, %v81_v18  ;;  %s400_s30 = sld [smem:[#allocation3 + $0x86]]  ;;  %s406_s6 = sld [smem:[#allocation8 + $0x5]] }
  0x33   :  { %v110_v28 = vmul.f32 %v109_v23, %v356_v1  ;;  %v113_v29 = vstv %s365_s22  ;;  %v121_v30 = vstv %s370_s0  ;;  %s408_s7 = sld [smem:[#allocation6 + $0x6]]  ;;  %s411_s8 = sld [smem:[#allocation3 + $0x7]]  ;;  %v102_v36 = vstv %s368_s23 }
  0x34   :  { %v70_v24 = vmax.f32 %v69_v16, 0.0  ;;  %v96_v26 = vadd.f32 %v95_v19, %v92_v14  ;;  %v124_v31 = vstv %s374_s24  ;;  %v85_v33 = vmax.f32 %v84_v25, 0.0  ;;  %s413_s3 = sld [smem:[#allocation3 + $0x87]]  ;;  %s426_s10 = sld [smem:[#allocation8 + $0x6]] }
  0x35   :  { %v122_v35 = vmul.f32 %v121_v30, %v349_v0  ;;  %v111_v37 = vadd.f32 %v110_v28, %v107_v27  ;;  %v125_v38 = vmul.f32 %v124_v31, %v356_v1  ;;  %v128_v39 = vstv %s376_s25  ;;  %s422_s9 = sld [smem:[#allocation6 + $0x7]]  ;;  %s300_s14 = smov [#allocation9]  }
  0x36   :  { %v73_v32 = vmul.f32 %v72_v17, %v70_v24  ;;  %v99_v34 = vadd.f32 %v98_v21, %v96_v26  ;;  %v88_v40 = vmul.f32 %v87_v20, %v85_v33  ;;  %v136_v42 = vstv %s379_s26  ;;  %s228_s11 = sld [smem:[#allocation8 + $0x7]]  ;;  %s190_s15 = sshll.u32 %s300_s14, 4  ;;  %s191_s15 = int_to_ptr.vmem [resolvable:$true] %s190_s15 }
  0x37   :  { %v139_v43 = vstv %s383_s2  ;;  %v114_v44 = vadd.f32 %v113_v29, %v111_v37  ;;  %v126_v45 = vadd.f32 %v125_v38, %v122_v35  ;;  %v137_v46 = vmul.f32 %v136_v42, %v349_v0  ;;  %s269_s16 = scalar_lea.vmem %s191_s15, 16  ;;  %s273_s17 = scalar_lea.vmem %s191_s15, 32 }
  0x38   :  { %v100_v41 = vmax.f32 %v99_v34, 0.0  ;;  %v140_v47 = vmul.f32 %v139_v43, %v356_v1  ;;  %v89_v48 = vadd.f32 %v88_v40, %v73_v32  ;;  %v117_v50 = vstv %s387_s1  ;;  %p270_p1 = scmp.ne.s32.totalorder %s191_s15, %s269_s16  ;;  %p274_p2 = scmp.lt.s32.totalorder %s191_s15, %s191_s15 }
  0x39   :  { %v143_v51 = vstv %s389_s27  ;;  %v115_v52 = vmax.f32 %v114_v44, 0.0  ;;  %v129_v53 = vadd.f32 %v128_v39, %v126_v45  ;;  %v151_v55 = vstv %s395_s28  ;;  %p275_p3 = scmp.lt.s32.totalorder %s273_s17, %s269_s16 }
  0x3a   :  { %v103_v49 = vmul.f32 %v102_v36, %v100_v41  ;;  %v141_v54 = vadd.f32 %v140_v47, %v137_v46  ;;  %v132_v57 = vstv %s398_s29  ;;  %v152_v58 = vmul.f32 %v151_v55, %v349_v0 }
  0x3b   :  { %v154_v59 = vstv %s400_s30  ;;  %v118_v60 = vmul.f32 %v117_v50, %v115_v52  ;;  %v130_v61 = vmax.f32 %v129_v53, 0.0  ;;  %v147_v2 = vstv %s406_s6  ;;  %p276_p4 = por %p275_p3, %p274_p2 }
  0x3c   :  { %v104_v56 = vadd.f32 %v103_v49, %v89_v48  ;;  %v144_v62 = vadd.f32 %v143_v51, %v141_v54  ;;  %v155_v63 = vmul.f32 %v154_v59, %v356_v1  ;;  %v158_v3 = vstv %s408_s7 }
  0x3d   :  { %v166_v4 = vstv %s411_s8  ;;  %v169_v5 = vstv %s413_s3  ;;  %v133_v7 = vmul.f32 %v132_v57, %v130_v61  ;;  %v173_v15 = vstv %s422_s9  ;;  %p277_p5 = pnand %p276_p4, %p270_p1 }
  0x3e   :  { %v119_v6 = vadd.f32 %v118_v60, %v104_v56  ;;  %v145_v8 = vmax.f32 %v144_v62, 0.0  ;;  %v156_v9 = vadd.f32 %v155_v63, %v152_v58  ;;  %v167_v10 = vmul.f32 %v166_v4, %v349_v0 }
  0x3f   :  { %v170_v11 = vmul.f32 %v169_v5, %v356_v1  ;;  %v162_v16 = vstv %s426_s10  ;;  %v177_v22 = vstv %s228_s11  ;;  %v181_v0 = vstv %s460_s4 }
  0x40   :  { %v134_v12 = vadd.f32 %v133_v7, %v119_v6  ;;  %v148_v13 = vmul.f32 %v147_v2, %v145_v8  ;;  %v159_v14 = vadd.f32 %v158_v3, %v156_v9 }
  0x41   :  { %v171_v17 = vadd.f32 %v170_v11, %v167_v10 }
  0x42   :  { %v149_v18 = vadd.f32 %v148_v13, %v134_v12  ;;  %v160_v19 = vmax.f32 %v159_v14, 0.0 }
  0x43   :  { %v174_v20 = vadd.f32 %v173_v15, %v171_v17 }
  0x44   :  { %v163_v21 = vmul.f32 %v162_v16, %v160_v19 }
  0x45   :  { %v175_v23 = vmax.f32 %v174_v20, 0.0 }
  0x46   :  { %v164_v24 = vadd.f32 %v163_v21, %v149_v18 }
  0x47   :  { %v178_v25 = vmul.f32 %v177_v22, %v175_v23 }
  0x49   :  { %v179_v1 = vadd.f32 %v178_v25, %v164_v24 }
  0x4b   :  { %v182_v26 = vadd.f32 %v181_v0, %v179_v1 }
  0x4d   :  { %183 = vst [vmem:[#allocation9] sm:$0x1] %v182_v26 }
  0x4e   :  { %280 = shalt.err (!%p277_p5)
}
  0x4f   :  { %s281_s20 = scalar_lea.hbm %s461_s5, 16 }
  0x50   :  { %p282_p6 = scmp.ne.s32.totalorder %s461_s5, %s281_s20  ;;  %p285_p7 = scmp.lt.u32.totalorder %s281_s20, %s461_s5 }
  0x52   :  { %p287_p8 = pnand %p285_p7, %p282_p6 }
  0x54   :  { %290 = shalt.err (!%p287_p8)
}
  0x55   :  { %193 = dma.vmem_to_hbm [thread:$0]  %s191_s15, 16, %s461_s5, [#allocation4]  }
  0x56   :  { %295 = dma.done.wait [#allocation4], 16  }
  0x57   :  { %296 = vsyncadd [#allocation4], 4294967280 }
  0x58   :  { %197 = vsyncpa [#allocation4], 1 }
  0x59   :  { %198 = vsyncpa [#allocation5], 1 }
  0x5a   :  { %199 = vsyncpa [#allocation7], 1 }

</bundles_post_ra>
